<compile_context>
chip_gen: v6e
topology: v6e:2x2x1
jax: 0.10.0
libtpu: 0.0.40
codegen_flags: <defaults>
</compile_context>

<pallas_src>
import jax
import jax.numpy as jnp
from jax.experimental import pallas as pl
from jax.experimental.pallas import tpu as pltpu


def fnn_kernel(x_ref, w1_ref, b1_ref, w2_ref, b2_ref, w3_ref, b3_ref, o_ref):
    # x_ref: (tile_b, D_in) bf16   w1: (D_in, H) bf16   w2: (H, H) bf16
    # w3: (H, D_out_pad) bf16      biases: (1, ...) f32  o_ref: (tile_b, D_out_pad) f32
    x = x_ref[...]

    h1 = jnp.dot(x, w1_ref[...], preferred_element_type=jnp.float32) + b1_ref[...]
    h1 = jnp.maximum(h1, 0.0).astype(jnp.bfloat16)          # ReLU on VPU, bf16 back into MXU

    h2 = jnp.dot(h1, w2_ref[...], preferred_element_type=jnp.float32) + b2_ref[...]
    h2 = jnp.maximum(h2, 0.0).astype(jnp.bfloat16)

    out = jnp.dot(h2, w3_ref[...], preferred_element_type=jnp.float32) + b3_ref[...]
    o_ref[...] = out.astype(o_ref.dtype)


def pack_params(params):
    """One-time packing for the kernel: bf16 weights, f32 biases, W3/b3 lane-padded
    to a multiple of 128 output columns so the final store is lane-dense."""
    w1, b1 = params["w1"], params["b1"]
    w2, b2 = params["w2"], params["b2"]
    w3, b3 = params["w3"], params["b3"]
    d_out = w3.shape[1]
    d_out_pad = 128 * pl.cdiv(d_out, 128)
    w3p = jnp.pad(w3, ((0, 0), (0, d_out_pad - d_out)))
    b3p = jnp.pad(b3, ((0, 0), (0, d_out_pad - d_out)))
    return dict(
        w1=w1.astype(jnp.bfloat16), b1=b1.astype(jnp.float32),
        w2=w2.astype(jnp.bfloat16), b2=b2.astype(jnp.float32),
        w3=w3p.astype(jnp.bfloat16), b3=b3p.astype(jnp.float32),
        d_in=w1.shape[0], d_hidden=w1.shape[1],
        d_out=d_out, d_out_pad=d_out_pad,
    )


def _choose_tile_b(B, tile_b_max):
    # bf16 sublane packing multiple is 16 rows; never pad a tiny batch up to a
    # big tile (B=2 -> 16 rows, not 128).
    b16 = 16 * pl.cdiv(B, 16)
    tile = min(tile_b_max, b16)
    # If the whole aligned batch would fit in one tile but is big enough to split,
    # halve the tile so dimension_semantics=("parallel",) can use both TCs (v7x).
    if tile == b16 and b16 >= 64:
        tile = 16 * pl.cdiv(b16 // 2, 16)
    return tile


def fnn_forward(x_nchw, packed, *, tile_b=512):
    """x_nchw: (B, C, H, W) float32. packed: output of pack_params()."""
    B, C, H, W = x_nchw.shape
    d_in = C * H * W
    assert packed["d_in"] == d_in, f"dim_in mismatch: {packed['d_in']} vs {d_in}"
    d_hidden = packed["d_hidden"]
    d_out = packed["d_out"]
    d_out_pad = packed["d_out_pad"]

    # torch .view equivalent, cast to bf16 BEFORE padding (no padded f32 copy in HBM).
    x2d = x_nchw.reshape(B, d_in).astype(jnp.bfloat16)

    tb = _choose_tile_b(B, tile_b)
    b_pad = tb * pl.cdiv(B, tb)
    if b_pad > B:
        x2d = jnp.pad(x2d, ((0, b_pad - B), (0, 0)))

    grid = (b_pad // tb,)

    out_padded = pl.pallas_call(
        fnn_kernel,
        out_shape=jax.ShapeDtypeStruct((b_pad, d_out_pad), jnp.float32),
        grid=grid,
        in_specs=[
            pl.BlockSpec((tb, d_in), lambda i: (i, 0)),            # x tile (pipelined)
            pl.BlockSpec((d_in, d_hidden), lambda i: (0, 0)),      # w1 (resident, constant idx)
            pl.BlockSpec((1, d_hidden), lambda i: (0, 0)),         # b1
            pl.BlockSpec((d_hidden, d_hidden), lambda i: (0, 0)),  # w2
            pl.BlockSpec((1, d_hidden), lambda i: (0, 0)),         # b2
            pl.BlockSpec((d_hidden, d_out_pad), lambda i: (0, 0)), # w3 (lane-padded)
            pl.BlockSpec((1, d_out_pad), lambda i: (0, 0)),        # b3 (lane-padded)
        ],
        out_specs=pl.BlockSpec((tb, d_out_pad), lambda i: (i, 0)),
        compiler_params=pltpu.CompilerParams(
            dimension_semantics=("parallel",),                     # shard batch tiles across TCs
        ),
    )(x2d, packed["w1"], packed["b1"], packed["w2"], packed["b2"],
      packed["w3"], packed["b3"])

    # Strip batch + lane padding back to the logical shape.
    return out_padded[:B, :d_out]


def init_params(key, dim_in, dim_hidden, dim_out):
    """Deterministic PyTorch-style Linear init (uniform +-1/sqrt(fan_in)), (in, out) layout."""
    ks = jax.random.split(key, 6)

    def lin(kw, kb, fan_in, fan_out):
        bound = 1.0 / jnp.sqrt(fan_in)
        w = jax.random.uniform(kw, (fan_in, fan_out), jnp.float32, -bound, bound)
        b = jax.random.uniform(kb, (1, fan_out), jnp.float32, -bound, bound)
        return w, b

    w1, b1 = lin(ks[0], ks[1], dim_in, dim_hidden)
    w2, b2 = lin(ks[2], ks[3], dim_hidden, dim_hidden)
    w3, b3 = lin(ks[4], ks[5], dim_hidden, dim_out)
    return dict(w1=w1, b1=b1, w2=w2, b2=b2, w3=w3, b3=b3)


def fnn_reference_f32(x_nchw, params):
    B = x_nchw.shape[0]
    x = x_nchw.reshape(B, -1)
    h = jnp.maximum(x @ params["w1"] + params["b1"], 0.0)
    h = jnp.maximum(h @ params["w2"] + params["b2"], 0.0)
    return h @ params["w3"] + params["b3"]


def fnn_reference_bf16(x_nchw, params):
    """Reference with the same bf16-input / f32-accumulate scheme as the kernel."""
    B = x_nchw.shape[0]
    x = x_nchw.reshape(B, -1).astype(jnp.bfloat16)
    w1 = params["w1"].astype(jnp.bfloat16)
    w2 = params["w2"].astype(jnp.bfloat16)
    w3 = params["w3"].astype(jnp.bfloat16)
    h = jnp.dot(x, w1, preferred_element_type=jnp.float32) + params["b1"]
    h = jnp.maximum(h, 0.0).astype(jnp.bfloat16)
    h = jnp.dot(h, w2, preferred_element_type=jnp.float32) + params["b2"]
    h = jnp.maximum(h, 0.0).astype(jnp.bfloat16)
    return jnp.dot(h, w3, preferred_element_type=jnp.float32) + params["b3"]


if __name__ == "__main__":
    # Small shapes consistent with the module: input (2, 4, 16, 16) -> dim_in = 1024.
    B, C, Himg, Wimg = 2, 4, 16, 16
    dim_in = C * Himg * Wimg
    dim_hidden = 256
    dim_out = 10

    key = jax.random.PRNGKey(0)
    kx, kp = jax.random.split(key)
    x = jax.random.normal(kx, (B, C, Himg, Wimg), jnp.float32)
    params = init_params(kp, dim_in, dim_hidden, dim_out)

    packed = pack_params(params)                       # one-time weight packing (bf16 + pad)
    out = jax.block_until_ready(fnn_forward(x, packed))
    assert out.shape == (B, dim_out), out.shape

    # Tight check against a reference using the identical bf16/f32 mixed-precision scheme.
    ref_bf16 = fnn_reference_bf16(x, params)
    assert jnp.allclose(out, ref_bf16, atol=1e-2, rtol=1e-2), "mismatch vs bf16-matched reference"

    # Loose check against the pure-f32 reference (bf16 quantization noise allowed).
    ref_f32 = fnn_reference_f32(x, params)
    assert jnp.allclose(out, ref_f32, atol=5e-2, rtol=5e-2), "mismatch vs f32 reference"

    print("KERNEL_OK")
</pallas_src>

<mosaic_0001>
module attributes {stable_mosaic.version = 11 : i64} {
  func.func @fnn_kernel(%arg0: i32, %arg1: memref<16x1024xbf16, #tpu.memory_space<vmem>>, %arg2: memref<1024x256xbf16, #tpu.memory_space<vmem>>, %arg3: memref<1x256xf32, #tpu.memory_space<vmem>>, %arg4: memref<256x256xbf16, #tpu.memory_space<vmem>>, %arg5: memref<1x256xf32, #tpu.memory_space<vmem>>, %arg6: memref<256x128xbf16, #tpu.memory_space<vmem>>, %arg7: memref<1x128xf32, #tpu.memory_space<vmem>>, %arg8: memref<16x128xf32, #tpu.memory_space<vmem>>) attributes {dimension_semantics = [#tpu.dimension_semantics<parallel>], iteration_bounds = array<i64: 1>, scalar_prefetch = 0 : i64, scratch_operands = 0 : i64, tpu.core_type = #tpu.core_type<tc>, window_params = [{transform_indices = @transform_0, window_bounds = array<i64: 16, 1024>}, {pipeline_mode = #tpu.pipeline_mode<synchronous>, transform_indices = @transform_1, window_bounds = array<i64: 1024, 256>}, {pipeline_mode = #tpu.pipeline_mode<synchronous>, transform_indices = @transform_2, window_bounds = array<i64: 1, 256>}, {pipeline_mode = #tpu.pipeline_mode<synchronous>, transform_indices = @transform_3, window_bounds = array<i64: 256, 256>}, {pipeline_mode = #tpu.pipeline_mode<synchronous>, transform_indices = @transform_4, window_bounds = array<i64: 1, 256>}, {pipeline_mode = #tpu.pipeline_mode<synchronous>, transform_indices = @transform_5, window_bounds = array<i64: 256, 128>}, {pipeline_mode = #tpu.pipeline_mode<synchronous>, transform_indices = @transform_6, window_bounds = array<i64: 1, 128>}, {transform_indices = @transform_7, window_bounds = array<i64: 16, 128>}]} {
    %c0 = arith.constant 0 : index
    %c0_0 = arith.constant 0 : index
    %0 = vector.load %arg1[%c0, %c0_0] : memref<16x1024xbf16, #tpu.memory_space<vmem>>, vector<16x1024xbf16>
    %c0_1 = arith.constant 0 : index
    %c0_2 = arith.constant 0 : index
    %1 = vector.load %arg2[%c0_1, %c0_2] : memref<1024x256xbf16, #tpu.memory_space<vmem>>, vector<1024x256xbf16>
    %cst = arith.constant dense<0.000000e+00> : vector<16x256xf32>
    %2 = tpu.matmul %0, %1, %cst {dimension_numbers = #tpu.dot_dimension_numbers<[1], [0], [0], [1], [0, 0, 1, 1], [], []>} : vector<16x1024xbf16>, vector<1024x256xbf16>, vector<16x256xf32> -> vector<16x256xf32>
    %c0_3 = arith.constant 0 : index
    %c0_4 = arith.constant 0 : index
    %3 = vector.load %arg3[%c0_3, %c0_4] : memref<1x256xf32, #tpu.memory_space<vmem>>, vector<1x256xf32>
    %4 = vector.broadcast %3 : vector<1x256xf32> to vector<16x256xf32>
    %5 = arith.addf %2, %4 : vector<16x256xf32>
    %cst_5 = arith.constant 0.000000e+00 : f32
    %6 = vector.broadcast %cst_5 : f32 to vector<16x256xf32>
    %7 = arith.maximumf %5, %6 : vector<16x256xf32>
    %8 = arith.truncf %7 : vector<16x256xf32> to vector<16x256xbf16>
    %c0_6 = arith.constant 0 : index
    %c0_7 = arith.constant 0 : index
    %9 = vector.load %arg4[%c0_6, %c0_7] : memref<256x256xbf16, #tpu.memory_space<vmem>>, vector<256x256xbf16>
    %cst_8 = arith.constant dense<0.000000e+00> : vector<16x256xf32>
    %10 = tpu.matmul %8, %9, %cst_8 {dimension_numbers = #tpu.dot_dimension_numbers<[1], [0], [0], [1], [0, 0, 1, 1], [], []>} : vector<16x256xbf16>, vector<256x256xbf16>, vector<16x256xf32> -> vector<16x256xf32>
    %c0_9 = arith.constant 0 : index
    %c0_10 = arith.constant 0 : index
    %11 = vector.load %arg5[%c0_9, %c0_10] : memref<1x256xf32, #tpu.memory_space<vmem>>, vector<1x256xf32>
    %12 = vector.broadcast %11 : vector<1x256xf32> to vector<16x256xf32>
    %13 = arith.addf %10, %12 : vector<16x256xf32>
    %cst_11 = arith.constant 0.000000e+00 : f32
    %14 = vector.broadcast %cst_11 : f32 to vector<16x256xf32>
    %15 = arith.maximumf %13, %14 : vector<16x256xf32>
    %16 = arith.truncf %15 : vector<16x256xf32> to vector<16x256xbf16>
    %c0_12 = arith.constant 0 : index
    %c0_13 = arith.constant 0 : index
    %17 = vector.load %arg6[%c0_12, %c0_13] : memref<256x128xbf16, #tpu.memory_space<vmem>>, vector<256x128xbf16>
    %cst_14 = arith.constant dense<0.000000e+00> : vector<16x128xf32>
    %18 = tpu.matmul %16, %17, %cst_14 {dimension_numbers = #tpu.dot_dimension_numbers<[1], [0], [0], [1], [0, 0, 1, 1], [], []>} : vector<16x256xbf16>, vector<256x128xbf16>, vector<16x128xf32> -> vector<16x128xf32>
    %c0_15 = arith.constant 0 : index
    %c0_16 = arith.constant 0 : index
    %19 = vector.load %arg7[%c0_15, %c0_16] : memref<1x128xf32, #tpu.memory_space<vmem>>, vector<1x128xf32>
    %20 = vector.broadcast %19 : vector<1x128xf32> to vector<16x128xf32>
    %21 = arith.addf %18, %20 : vector<16x128xf32>
    %c0_17 = arith.constant 0 : index
    %c0_18 = arith.constant 0 : index
    %22 = vector.load %arg8[%c0_17, %c0_18] : memref<16x128xf32, #tpu.memory_space<vmem>>, vector<16x128xf32>
    tpu.vector_store %arg8[%c0_17, %c0_18], %21 {strides = array<i32>} : memref<16x128xf32, #tpu.memory_space<vmem>>, vector<16x128xf32>,
    return
  }
  func.func @transform_0(%arg0: i32) -> (i32, i32) {
    %c0_i32 = arith.constant 0 : i32
    %c0_i32_0 = arith.constant 0 : i32
    return %arg0, %c0_i32 : i32, i32
  }
  func.func @transform_1(%arg0: i32) -> (i32, i32) {
    %c0_i32 = arith.constant 0 : i32
    %c0_i32_0 = arith.constant 0 : i32
    %c0_i32_1 = arith.constant 0 : i32
    return %c0_i32, %c0_i32_0 : i32, i32
  }
  func.func @transform_2(%arg0: i32) -> (i32, i32) {
    %c0_i32 = arith.constant 0 : i32
    %c0_i32_0 = arith.constant 0 : i32
    %c0_i32_1 = arith.constant 0 : i32
    return %c0_i32, %c0_i32_0 : i32, i32
  }
  func.func @transform_3(%arg0: i32) -> (i32, i32) {
    %c0_i32 = arith.constant 0 : i32
    %c0_i32_0 = arith.constant 0 : i32
    %c0_i32_1 = arith.constant 0 : i32
    return %c0_i32, %c0_i32_0 : i32, i32
  }
  func.func @transform_4(%arg0: i32) -> (i32, i32) {
    %c0_i32 = arith.constant 0 : i32
    %c0_i32_0 = arith.constant 0 : i32
    %c0_i32_1 = arith.constant 0 : i32
    return %c0_i32, %c0_i32_0 : i32, i32
  }
  func.func @transform_5(%arg0: i32) -> (i32, i32) {
    %c0_i32 = arith.constant 0 : i32
    %c0_i32_0 = arith.constant 0 : i32
    %c0_i32_1 = arith.constant 0 : i32
    return %c0_i32, %c0_i32_0 : i32, i32
  }
  func.func @transform_6(%arg0: i32) -> (i32, i32) {
    %c0_i32 = arith.constant 0 : i32
    %c0_i32_0 = arith.constant 0 : i32
    %c0_i32_1 = arith.constant 0 : i32
    return %c0_i32, %c0_i32_0 : i32, i32
  }
  func.func @transform_7(%arg0: i32) -> (i32, i32) {
    %c0_i32 = arith.constant 0 : i32
    %c0_i32_0 = arith.constant 0 : i32
    return %arg0, %c0_i32 : i32, i32
  }
}

</mosaic_0001>

<bundles_post_ra>
// kernel: tpu_custom_call.1
= control target key start
LH: loop header
LB: loop body
LE: loop exit
PB: predicated region body
PF: predicated region fallthrough
CT: control target
= control target key end

     0   :  { %12 = vsyncpa [#allocation3], 0  ;;  %s2221_s0 = inlined_call_operand.hbm [shape: bf16[16,1024], index: 0, kind: input, shape index: {}]   ;;  %s2222_s1 = inlined_call_operand.hbm [shape: bf16[1024,256], index: 1, kind: input, shape index: {}]   ;;  %s2223_s2 = inlined_call_operand.vmem [shape: f32[1,256], index: 2, kind: input, shape index: {}]   ;;  %s2224_s3 = inlined_call_operand.hbm [shape: bf16[256,256], index: 3, kind: input, shape index: {}]   ;;  %s2225_s4 = inlined_call_operand.vmem [shape: f32[1,256], index: 4, kind: input, shape index: {}]   ;;  %s2226_s5 = inlined_call_operand.hbm [shape: bf16[256,128], index: 5, kind: input, shape index: {}]   ;;  %s2227_s6 = inlined_call_operand.vmem [shape: f32[1,128], index: 6, kind: input, shape index: {}]   ;;  %s2228_s7 = inlined_call_operand.hbm [shape: f32[16,128], index: 7, kind: output, shape index: {}]  }
   0x1   :  { %13 = vsyncpa [#allocation6], 0 }
   0x2   :  { %14 = vsyncpa [#allocation9], 0 }
   0x3   :  { %15 = vsyncpa [#allocation4], 0  ;;  %s2121_s24 = smov [#allocation5]  }
   0x4   :  { %s33_s25 = sshll.u32 %s2121_s24, 4  ;;  %s34_s25 = int_to_ptr.vmem [resolvable:$true] %s33_s25 }
   0x5   :  { %s2021_s26 = scalar_lea.vmem %s34_s25, 16384  ;;  %p2026_p1 = scmp.lt.s32.totalorder %s34_s25, %s34_s25 }
   0x6   :  { %p2022_p0 = scmp.ne.s32.totalorder %s34_s25, %s2021_s26  ;;  %p2027_p2 = scmp.lt.s32.totalorder %s2021_s26, %s2021_s26 }
   0x8   :  { %p2028_p3 = por %p2027_p2, %p2026_p1 }
   0xa   :  { %p2029_p4 = pnand %p2028_p3, %p2022_p0 }
   0xc   :  { %2032 = shalt.err (!%p2029_p4)
}
   0xd   :  { %s2122_s27 = smov 128   ;;  %s2123_s28 = smov 8  }
   0xe   :  { %39 = dma.hbm_to_vmem [thread:$0]  %s2222_s1, 16384, %s34_s25, [#allocation6], %s2122_s27, %s2122_s27, %s2123_s28  }
   0xf   :  { %s2124_s8 = smov [#allocation2]  }
  0x10   :  { %s21_s9 = sshll.u32 %s2124_s8, 4  ;;  %s22_s9 = int_to_ptr.vmem [resolvable:$true] %s21_s9 }
  0x11   :  { %s2041_s10 = scalar_lea.vmem %s22_s9, 1024  ;;  %p2046_p6 = scmp.lt.s32.totalorder %s22_s9, %s22_s9 }
  0x12   :  { %p2042_p5 = scmp.ne.s32.totalorder %s22_s9, %s2041_s10  ;;  %p2047_p7 = scmp.lt.s32.totalorder %s2041_s10, %s2041_s10 }
  0x14   :  { %p2048_p8 = por %p2047_p7, %p2046_p6 }
  0x16   :  { %p2049_p9 = pnand %p2048_p8, %p2042_p5 }
  0x18   :  { %2052 = shalt.err (!%p2049_p9)
}
  0x19   :  { %s2125_s11 = smov 512   ;;  %s2126_s12 = smov 32  }
  0x1a   :  { %27 = dma.hbm_to_vmem [thread:$0]  %s2221_s0, 1024, %s22_s9, [#allocation3], %s2125_s11, %s2125_s11, %s2126_s12  }
  0x1b   :  { %s2127_s15 = smov [#allocation7]   ;;  %s2128_s17 = smov [#allocation8]  }
  0x1c   :  { %s47_s16 = sshll.u32 %s2127_s15, 4  ;;  %s61_s1 = sshll.u32 %s2128_s17, 4  ;;  %s48_s16 = int_to_ptr.vmem [resolvable:$true] %s47_s16  ;;  %s62_s1 = int_to_ptr.vmem [resolvable:$true] %s61_s1 }
  0x1d   :  { %s2061_s18 = scalar_lea.vmem %s48_s16, 4096  ;;  %p2066_p11 = scmp.lt.s32.totalorder %s48_s16, %s48_s16 }
  0x1e   :  { %p2062_p10 = scmp.ne.s32.totalorder %s48_s16, %s2061_s18  ;;  %p2067_p12 = scmp.lt.s32.totalorder %s2061_s18, %s2061_s18 }
  0x20   :  { %p2068_p13 = por %p2067_p12, %p2066_p11 }
  0x22   :  { %p2069_p0 = pnand %p2068_p13, %p2062_p10 }
  0x24   :  { %2072 = shalt.err (!%p2069_p0)
}
  0x25   :  { %53 = dma.hbm_to_vmem [thread:$0]  %s2224_s3, 4096, %s48_s16, [#allocation6], %s2122_s27, %s2122_s27, %s2123_s28  }
  0x26   :  { %s2081_s0 = scalar_lea.vmem %s62_s1, 2048  ;;  %p2086_p2 = scmp.lt.s32.totalorder %s62_s1, %s62_s1 }
  0x27   :  { %p2082_p1 = scmp.ne.s32.totalorder %s62_s1, %s2081_s0  ;;  %p2087_p3 = scmp.lt.s32.totalorder %s2081_s0, %s2081_s0 }
  0x29   :  { %p2088_p4 = por %p2087_p3, %p2086_p2 }
  0x2b   :  { %p2089_p5 = pnand %p2088_p4, %p2082_p1 }
  0x2d   :  { %2092 = shalt.err (!%p2089_p5)
}
  0x2e   :  { %s2129_s21 = smov 64   ;;  %s2130_s22 = smov 4  }
  0x2f   :  { %67 = dma.hbm_to_vmem [thread:$0]  %s2226_s5, 2048, %s62_s1, [#allocation9], %s2129_s21, %s2129_s21, %s2130_s22  }
  0x30   :  { %2113 = dma.done.wait [#allocation3], 1024  }
  0x31   :  { %2114 = vsyncadd [#allocation3], 4294966272 }
  0x32   :  { %2115 = dma.done.wait [#allocation6], 20480  }
  0x33   :  { %2116 = vsyncadd [#allocation6], 4294946816 }
  0x34   :  { %2117 = dma.done.wait [#allocation9], 2048  }
  0x35   :  { %2118 = vsyncadd [#allocation9], 4294965248  ;;  %v1757_v0 = vld [vmem:[#allocation5 + $0x74] ss:$8 sps:$4 sm:$0xff]   ;;  %v1761_v2 = vld [vmem:[#allocation5 + $0x70] ss:$8 sps:$4 sm:$0xff]  }
  0x36   :  { %v1759_v1 = vld [vmem:[#allocation5 + $0x174] ss:$8 sps:$4 sm:$0xff]   ;;  %911 = vmatprep.subr.bf16.mxu0 %v1757_v0  ;;  %v1762_v3 = vld [vmem:[#allocation5 + $0x170] ss:$8 sps:$4 sm:$0xff]   ;;  %v1763_v4 = vld [vmem:[#allocation5 + $0x64] ss:$8 sps:$4 sm:$0xff]  }
  0x37   :  { %954 = vmatprep.subr.bf16.mxu1 %v1759_v1  ;;  %912 = vmatpush1.bf16.msra.mxu0 %v1761_v2  ;;  %v1765_v5 = vld [vmem:[#allocation5 + $0x164] ss:$8 sps:$4 sm:$0xff]   ;;  %v1767_v6 = vld [vmem:[#allocation5 + $0x60] ss:$8 sps:$4 sm:$0xff]   ;;  %v1769_v8 = vld [vmem:[#allocation5 + $0x54] ss:$8 sps:$4 sm:$0xff]  }
  0x38   :  { %955 = vmatpush1.bf16.msra.mxu1 %v1762_v3  ;;  %913 = vmatprep.subr.bf16.mxu0 %v1763_v4  ;;  %v1768_v7 = vld [vmem:[#allocation5 + $0x160] ss:$8 sps:$4 sm:$0xff]   ;;  %v1771_v9 = vld [vmem:[#allocation5 + $0x154] ss:$8 sps:$4 sm:$0xff]   ;;  %v1773_v10 = vld [vmem:[#allocation5 + $0x50] ss:$8 sps:$4 sm:$0xff]  }
  0x39   :  { %956 = vmatprep.subr.bf16.mxu1 %v1765_v5  ;;  %v1774_v11 = vld [vmem:[#allocation5 + $0x150] ss:$8 sps:$4 sm:$0xff]   ;;  %v1775_v12 = vld [vmem:[#allocation5 + $0x44] ss:$8 sps:$4 sm:$0xff]   ;;  %v1779_v14 = vld [vmem:[#allocation5 + $0x40] ss:$8 sps:$4 sm:$0xff]  }
  0x3a   :  { %v1777_v13 = vld [vmem:[#allocation5 + $0x144] ss:$8 sps:$4 sm:$0xff]   ;;  %v1780_v15 = vld [vmem:[#allocation5 + $0x140] ss:$8 sps:$4 sm:$0xff]   ;;  %v1781_v16 = vld [vmem:[#allocation5 + $0x34] ss:$8 sps:$4 sm:$0xff]  }
  0x3b   :  { %914 = vmatpush1.bf16.msra.mxu0 %v1767_v6  ;;  %v1783_v17 = vld [vmem:[#allocation5 + $0x134] ss:$8 sps:$4 sm:$0xff]   ;;  %v1785_v18 = vld [vmem:[#allocation5 + $0x30] ss:$8 sps:$4 sm:$0xff]   ;;  %v1787_v20 = vld [vmem:[#allocation5 + $0x24] ss:$8 sps:$4 sm:$0xff]  }
  0x3c   :  { %957 = vmatpush1.bf16.msra.mxu1 %v1768_v7  ;;  %915 = vmatprep.subr.bf16.mxu0 %v1769_v8  ;;  %v1786_v19 = vld [vmem:[#allocation5 + $0x130] ss:$8 sps:$4 sm:$0xff]   ;;  %v1789_v21 = vld [vmem:[#allocation5 + $0x124] ss:$8 sps:$4 sm:$0xff]   ;;  %v1791_v22 = vld [vmem:[#allocation5 + $0x20] ss:$8 sps:$4 sm:$0xff]  }
  0x3d   :  { %958 = vmatprep.subr.bf16.mxu1 %v1771_v9  ;;  %v1792_v23 = vld [vmem:[#allocation5 + $0x120] ss:$8 sps:$4 sm:$0xff]   ;;  %v1793_v24 = vld [vmem:[#allocation5 + $0x14] ss:$8 sps:$4 sm:$0xff]   ;;  %v1797_v26 = vld [vmem:[#allocation5 + $0x10] ss:$8 sps:$4 sm:$0xff]  }
  0x3e   :  { %v1795_v25 = vld [vmem:[#allocation5 + $0x114] ss:$8 sps:$4 sm:$0xff]   ;;  %v1798_v27 = vld [vmem:[#allocation5 + $0x110] ss:$8 sps:$4 sm:$0xff]   ;;  %v1799_v28 = vld [vmem:[#allocation5 + $0x4] ss:$8 sps:$4 sm:$0xff]  }
  0x3f   :  { %916 = vmatpush1.bf16.msra.mxu0 %v1773_v10  ;;  %v1801_v29 = vld [vmem:[#allocation5 + $0x104] ss:$8 sps:$4 sm:$0xff]   ;;  %v1803_v30 = vld [vmem:[#allocation5] ss:$8 sps:$4 sm:$0xff]   ;;  %v1805_v32 = vld [vmem:[#allocation5 + $0xf4] ss:$8 sps:$4 sm:$0xff]  }
  0x40   :  { %959 = vmatpush1.bf16.msra.mxu1 %v1774_v11  ;;  %917 = vmatprep.subr.bf16.mxu0 %v1775_v12  ;;  %v1804_v31 = vld [vmem:[#allocation5 + $0x100] ss:$8 sps:$4 sm:$0xff]   ;;  %v1807_v33 = vld [vmem:[#allocation5 + $0x1f4] ss:$8 sps:$4 sm:$0xff]   ;;  %v1809_v34 = vld [vmem:[#allocation5 + $0xf0] ss:$8 sps:$4 sm:$0xff]  }
  0x41   :  { %960 = vmatprep.subr.bf16.mxu1 %v1777_v13  ;;  %v1810_v35 = vld [vmem:[#allocation5 + $0x1f0] ss:$8 sps:$4 sm:$0xff]   ;;  %v1811_v36 = vld [vmem:[#allocation5 + $0xe4] ss:$8 sps:$4 sm:$0xff]   ;;  %v1815_v38 = vld [vmem:[#allocation5 + $0xe0] ss:$8 sps:$4 sm:$0xff]  }
  0x42   :  { %v1813_v37 = vld [vmem:[#allocation5 + $0x1e4] ss:$8 sps:$4 sm:$0xff]   ;;  %v1816_v39 = vld [vmem:[#allocation5 + $0x1e0] ss:$8 sps:$4 sm:$0xff]   ;;  %v1817_v40 = vld [vmem:[#allocation5 + $0xd4] ss:$8 sps:$4 sm:$0xff]  }
  0x43   :  { %918 = vmatpush1.bf16.msra.mxu0 %v1779_v14  ;;  %v1819_v41 = vld [vmem:[#allocation5 + $0x1d4] ss:$8 sps:$4 sm:$0xff]   ;;  %v1821_v42 = vld [vmem:[#allocation5 + $0xd0] ss:$8 sps:$4 sm:$0xff]   ;;  %v1823_v44 = vld [vmem:[#allocation5 + $0xc4] ss:$8 sps:$4 sm:$0xff]  }
  0x44   :  { %961 = vmatpush1.bf16.msra.mxu1 %v1780_v15  ;;  %919 = vmatprep.subr.bf16.mxu0 %v1781_v16  ;;  %v1822_v43 = vld [vmem:[#allocation5 + $0x1d0] ss:$8 sps:$4 sm:$0xff]   ;;  %v1825_v45 = vld [vmem:[#allocation5 + $0x1c4] ss:$8 sps:$4 sm:$0xff]   ;;  %v1827_v46 = vld [vmem:[#allocation5 + $0xc0] ss:$8 sps:$4 sm:$0xff]  }
  0x45   :  { %962 = vmatprep.subr.bf16.mxu1 %v1783_v17  ;;  %v1828_v47 = vld [vmem:[#allocation5 + $0x1c0] ss:$8 sps:$4 sm:$0xff]   ;;  %v1829_v52 = vld [vmem:[#allocation5 + $0xb4] ss:$8 sps:$4 sm:$0xff]   ;;  %v1833_v56 = vld [vmem:[#allocation5 + $0xb0] ss:$8 sps:$4 sm:$0xff]  }
  0x46   :  { %v83_v48 = vld [vmem:[#allocation2] sm:$0xff]  ;;  %v84_v50 = vld [vmem:[#allocation2 + $0x8] sm:$0xff]  ;;  %v1831_v54 = vld [vmem:[#allocation5 + $0x1b4] ss:$8 sps:$4 sm:$0xff]   ;;  %s2131_s29 = smov [#allocation10]  }
  0x47   :  { %920 = vmatpush1.bf16.msra.mxu0 %v1785_v18  ;;  %v87_v49 = vld [vmem:[#allocation2 + $0x20] sm:$0xff]  ;;  %v88_v51 = vld [vmem:[#allocation2 + $0x28] sm:$0xff]  ;;  %v1834_v57 = vld [vmem:[#allocation5 + $0x1b0] ss:$8 sps:$4 sm:$0xff]   ;;  %s1525_s30 = sshll.u32 %s2131_s29, 4  ;;  %s1526_s30 = int_to_ptr.vmem [resolvable:$true] %s1525_s30 }
  0x48   :  { %963 = vmatpush1.bf16.msra.mxu1 %v1786_v19  ;;  %921 = vmatprep.subr.bf16.mxu0 %v1787_v20  ;;  %v1540_v53 = vcombine.high %v83_v48, %v87_v49  ;;  %v1542_v55 = vcombine.high %v84_v50, %v88_v51  ;;  %v1835_v58 = vld [vmem:[#allocation5 + $0xa4] ss:$8 sps:$4 sm:$0xff]   ;;  %v1839_v60 = vld [vmem:[#allocation5 + $0xa0] ss:$8 sps:$4 sm:$0xff]   ;;  %v1841_v62 = vld [vmem:[#allocation5 + $0x94] ss:$8 sps:$4 sm:$0xff]   ;;  %v1539_v8 = vcombine.low %v83_v48, %v87_v49  ;;  %p2098_p7 = scmp.lt.s32.totalorder %s1526_s30, %s1526_s30 }
  0x49   :  { %964 = vmatprep.subr.bf16.mxu1 %v1789_v21  ;;  %v1837_v59 = vld [vmem:[#allocation5 + $0x1a4] ss:$8 sps:$4 sm:$0xff]   ;;  %v1840_v61 = vld [vmem:[#allocation5 + $0x1a0] ss:$8 sps:$4 sm:$0xff]   ;;  %v1843_v63 = vld [vmem:[#allocation5 + $0x194] ss:$8 sps:$4 sm:$0xff]   ;;  %v1541_v9 = vcombine.low %v84_v50, %v88_v51 }
  0x4a   :  { %943 = vmatprep.mubr.bf16.mxu0 %v1540_v53  ;;  %986 = vmatprep.mubr.bf16.mxu1 %v1542_v55  ;;  %v1845_v0 = vld [vmem:[#allocation5 + $0x90] ss:$8 sps:$4 sm:$0xff]   ;;  %v1847_v2 = vld [vmem:[#allocation5 + $0x84] ss:$8 sps:$4 sm:$0xff]   ;;  %v1851_v4 = vld [vmem:[#allocation5 + $0x80] ss:$8 sps:$4 sm:$0xff]  }
  0x4b   :  { %922 = vmatpush1.bf16.msra.mxu0 %v1791_v22  ;;  %v1846_v1 = vld [vmem:[#allocation5 + $0x190] ss:$8 sps:$4 sm:$0xff]   ;;  %v1849_v3 = vld [vmem:[#allocation5 + $0x184] ss:$8 sps:$4 sm:$0xff]   ;;  %v1852_v5 = vld [vmem:[#allocation5 + $0x180] ss:$8 sps:$4 sm:$0xff]  }
  0x4c   :  { %965 = vmatpush1.bf16.msra.mxu1 %v1792_v23  ;;  %923 = vmatprep.subr.bf16.mxu0 %v1793_v24  ;;  %v1855_v6 = vld [vmem:[#allocation5 + $0x274] ss:$8 sps:$4 sm:$0xff]   ;;  %v1853_v10 = vld [vmem:[#allocation5 + $0x270] ss:$8 sps:$4 sm:$0xff]   ;;  %v1861_v12 = vld [vmem:[#allocation5 + $0x264] ss:$8 sps:$4 sm:$0xff]  }
  0x4d   :  { %966 = vmatprep.subr.bf16.mxu1 %v1795_v25  ;;  %v1858_v7 = vld [vmem:[#allocation5 + $0x374] ss:$8 sps:$4 sm:$0xff]   ;;  %v1856_v11 = vld [vmem:[#allocation5 + $0x370] ss:$8 sps:$4 sm:$0xff]   ;;  %v1864_v13 = vld [vmem:[#allocation5 + $0x364] ss:$8 sps:$4 sm:$0xff]  }
  0x4e   :  { %v1859_v14 = vld [vmem:[#allocation5 + $0x260] ss:$8 sps:$4 sm:$0xff]   ;;  %v1867_v16 = vld [vmem:[#allocation5 + $0x254] ss:$8 sps:$4 sm:$0xff]   ;;  %v1865_v18 = vld [vmem:[#allocation5 + $0x250] ss:$8 sps:$4 sm:$0xff]  }
  0x4f   :  { %924 = vmatpush1.bf16.msra.mxu0 %v1797_v26  ;;  %v1862_v15 = vld [vmem:[#allocation5 + $0x360] ss:$8 sps:$4 sm:$0xff]   ;;  %v1870_v17 = vld [vmem:[#allocation5 + $0x354] ss:$8 sps:$4 sm:$0xff]   ;;  %v1868_v19 = vld [vmem:[#allocation5 + $0x350] ss:$8 sps:$4 sm:$0xff]  }
  0x50   :  { %967 = vmatpush1.bf16.msra.mxu1 %v1798_v27  ;;  %925 = vmatprep.subr.bf16.mxu0 %v1799_v28  ;;  %v1873_v20 = vld [vmem:[#allocation5 + $0x244] ss:$8 sps:$4 sm:$0xff]   ;;  %v1871_v22 = vld [vmem:[#allocation5 + $0x240] ss:$8 sps:$4 sm:$0xff]   ;;  %v1879_v24 = vld [vmem:[#allocation5 + $0x234] ss:$8 sps:$4 sm:$0xff]  }
  0x51   :  { %968 = vmatprep.subr.bf16.mxu1 %v1801_v29  ;;  %v1876_v21 = vld [vmem:[#allocation5 + $0x344] ss:$8 sps:$4 sm:$0xff]   ;;  %v1874_v23 = vld [vmem:[#allocation5 + $0x340] ss:$8 sps:$4 sm:$0xff]   ;;  %v1882_v25 = vld [vmem:[#allocation5 + $0x334] ss:$8 sps:$4 sm:$0xff]  }
  0x52   :  { %v1877_v26 = vld [vmem:[#allocation5 + $0x230] ss:$8 sps:$4 sm:$0xff]   ;;  %v1885_v28 = vld [vmem:[#allocation5 + $0x224] ss:$8 sps:$4 sm:$0xff]   ;;  %v1910_v53 = vld [vmem:[#allocation5 + $0x3e0] ss:$8 sps:$4 sm:$0xff]  }
  0x53   :  { %926 = vmatpush1.bf16.msra.mxu0 %v1803_v30  ;;  %v1880_v27 = vld [vmem:[#allocation5 + $0x330] ss:$8 sps:$4 sm:$0xff]   ;;  %v1888_v29 = vld [vmem:[#allocation5 + $0x324] ss:$8 sps:$4 sm:$0xff]   ;;  %v1883_v30 = vld [vmem:[#allocation5 + $0x220] ss:$8 sps:$4 sm:$0xff]  }
  0x54   :  { %969 = vmatpush1.bf16.msra.mxu1 %v1804_v31  ;;  %927 = vmatprep.subr.bf16.mxu0 %v1805_v32  ;;  %v1886_v31 = vld [vmem:[#allocation5 + $0x320] ss:$8 sps:$4 sm:$0xff]   ;;  %v1891_v32 = vld [vmem:[#allocation5 + $0x214] ss:$8 sps:$4 sm:$0xff]   ;;  %v1901_v48 = vld [vmem:[#allocation5 + $0x2f0] ss:$8 sps:$4 sm:$0xff]  }
  0x55   :  { %970 = vmatprep.subr.bf16.mxu1 %v1807_v33  ;;  %v1894_v33 = vld [vmem:[#allocation5 + $0x314] ss:$8 sps:$4 sm:$0xff]   ;;  %v1904_v49 = vld [vmem:[#allocation5 + $0x3f0] ss:$8 sps:$4 sm:$0xff]   ;;  %v1909_v50 = vld [vmem:[#allocation5 + $0x2e4] ss:$8 sps:$4 sm:$0xff]  }
  0x56   :  { %v1912_v51 = vld [vmem:[#allocation5 + $0x3e4] ss:$8 sps:$4 sm:$0xff]   ;;  %v1918_v55 = vld [vmem:[#allocation5 + $0x3d4] ss:$8 sps:$4 sm:$0xff]   ;;  %s2093_s8 = scalar_lea.vmem %s1526_s30, 256 }
  0x57   :  { %928 = vmatpush2.bf16.msra.mxu0 %v1809_v34  ;;  %v1889_v34 = vld [vmem:[#allocation5 + $0x210] ss:$8 sps:$4 sm:$0xff]   ;;  %p2094_p6 = scmp.ne.s32.totalorder %s1526_s30, %s2093_s8  ;;  %p2099_p8 = scmp.lt.s32.totalorder %s2093_s8, %s2093_s8 }
  0x58   :  { %971 = vmatpush2.bf16.msra.mxu1 %v1810_v35  ;;  %929 = vmatprep.subr.bf16.mxu0 %v1811_v36  ;;  %v1892_v35 = vld [vmem:[#allocation5 + $0x310] ss:$8 sps:$4 sm:$0xff]  }
  0x59   :  { %972 = vmatprep.subr.bf16.mxu1 %v1813_v37  ;;  %v2190_v36 = vld [vmem:[#allocation2 + $0x10] sm:$0xff]  ;;  %v1897_v37 = vld [vmem:[#allocation5 + $0x204] ss:$8 sps:$4 sm:$0xff]   ;;  %p2100_p9 = por %p2099_p8, %p2098_p7 }
  0x5b   :  { %930 = vmatpush2.bf16.msra.mxu0 %v1815_v38  ;;  %v2192_v38 = vld [vmem:[#allocation2 + $0x30] sm:$0xff]  ;;  %p2101_p10 = pnand %p2100_p9, %p2094_p6 }
  0x5c   :  { %973 = vmatpush2.bf16.msra.mxu1 %v1816_v39  ;;  %931 = vmatprep.subr.bf16.mxu0 %v1817_v40  ;;  %v2194_v39 = vld [vmem:[#allocation2 + $0x18] sm:$0xff] }
  0x5d   :  { %974 = vmatprep.subr.bf16.mxu1 %v1819_v41  ;;  %v2196_v40 = vld [vmem:[#allocation2 + $0x38] sm:$0xff]  ;;  %v1900_v41 = vld [vmem:[#allocation5 + $0x304] ss:$8 sps:$4 sm:$0xff]  }
  0x5f   :  { %932 = vmatpush2.bf16.msra.mxu0 %v1821_v42  ;;  %v1544_v42 = vcombine.high %v2190_v36, %v2192_v38 }
  0x60   :  { %975 = vmatpush2.bf16.msra.mxu1 %v1822_v43  ;;  %933 = vmatprep.subr.bf16.mxu0 %v1823_v44  ;;  %v1546_v43 = vcombine.high %v2194_v39, %v2196_v40  ;;  %v1895_v44 = vld [vmem:[#allocation5 + $0x200] ss:$8 sps:$4 sm:$0xff]  }
  0x61   :  { %976 = vmatprep.subr.bf16.mxu1 %v1825_v45  ;;  %v1898_v45 = vld [vmem:[#allocation5 + $0x300] ss:$8 sps:$4 sm:$0xff]  }
  0x63   :  { %934 = vmatpush2.bf16.msra.mxu0 %v1827_v46  ;;  %v1903_v46 = vld [vmem:[#allocation5 + $0x2f4] ss:$8 sps:$4 sm:$0xff]  }
  0x64   :  { %977 = vmatpush2.bf16.msra.mxu1 %v1828_v47  ;;  %935 = vmatprep.subr.bf16.mxu0 %v1829_v52  ;;  %v1906_v47 = vld [vmem:[#allocation5 + $0x3f4] ss:$8 sps:$4 sm:$0xff]   ;;  %v1907_v52 = vld [vmem:[#allocation5 + $0x2e0] ss:$8 sps:$4 sm:$0xff]  }
  0x65   :  { %978 = vmatprep.subr.bf16.mxu1 %v1831_v54  ;;  %v1915_v54 = vld [vmem:[#allocation5 + $0x2d4] ss:$8 sps:$4 sm:$0xff]  }
  0x67   :  { %936 = vmatpush2.bf16.msra.mxu0 %v1833_v56  ;;  %v1913_v56 = vld [vmem:[#allocation5 + $0x2d0] ss:$8 sps:$4 sm:$0xff]  }
  0x68   :  { %979 = vmatpush2.bf16.msra.mxu1 %v1834_v57  ;;  %937 = vmatprep.subr.bf16.mxu0 %v1835_v58  ;;  %v1916_v57 = vld [vmem:[#allocation5 + $0x3d0] ss:$8 sps:$4 sm:$0xff]   ;;  %v1921_v58 = vld [vmem:[#allocation5 + $0x2c4] ss:$8 sps:$4 sm:$0xff]  }
  0x69   :  { %980 = vmatprep.subr.bf16.mxu1 %v1837_v59  ;;  %v1924_v59 = vld [vmem:[#allocation5 + $0x3c4] ss:$8 sps:$4 sm:$0xff]  }
  0x6b   :  { %938 = vmatpush2.bf16.msra.mxu0 %v1839_v60  ;;  %v1919_v60 = vld [vmem:[#allocation5 + $0x2c0] ss:$8 sps:$4 sm:$0xff]  }
  0x6c   :  { %981 = vmatpush2.bf16.msra.mxu1 %v1840_v61  ;;  %939 = vmatprep.subr.bf16.mxu0 %v1841_v62  ;;  %v1922_v61 = vld [vmem:[#allocation5 + $0x3c0] ss:$8 sps:$4 sm:$0xff]   ;;  %v1927_v62 = vld [vmem:[#allocation5 + $0x2b4] ss:$8 sps:$4 sm:$0xff]  }
  0x6d   :  { %982 = vmatprep.subr.bf16.mxu1 %v1843_v63  ;;  %v1930_v63 = vld [vmem:[#allocation5 + $0x3b4] ss:$8 sps:$4 sm:$0xff]  }
  0x6f   :  { %940 = vmatpush2.bf16.msra.mxu0 %v1845_v0  ;;  %v1925_v0 = vld [vmem:[#allocation5 + $0x2b0] ss:$8 sps:$4 sm:$0xff]  }
  0x70   :  { %983 = vmatpush2.bf16.msra.mxu1 %v1846_v1  ;;  %941 = vmatprep.subr.bf16.mxu0 %v1847_v2  ;;  %v1928_v1 = vld [vmem:[#allocation5 + $0x3b0] ss:$8 sps:$4 sm:$0xff]   ;;  %v1933_v2 = vld [vmem:[#allocation5 + $0x2a4] ss:$8 sps:$4 sm:$0xff]  }
  0x71   :  { %984 = vmatprep.subr.bf16.mxu1 %v1849_v3  ;;  %v1936_v3 = vld [vmem:[#allocation5 + $0x3a4] ss:$8 sps:$4 sm:$0xff]  }
  0x73   :  { %942 = vmatpush2.bf16.msra.mxu0 %v1851_v4  ;;  %v1931_v4 = vld [vmem:[#allocation5 + $0x2a0] ss:$8 sps:$4 sm:$0xff]  }
  0x74   :  { %985 = vmatpush2.bf16.msra.mxu1 %v1852_v5  ;;  %997 = vmatprep.subr.bf16.mxu0 %v1855_v6  ;;  %v1934_v5 = vld [vmem:[#allocation5 + $0x3a0] ss:$8 sps:$4 sm:$0xff]   ;;  %v1939_v6 = vld [vmem:[#allocation5 + $0x294] ss:$8 sps:$4 sm:$0xff]  }
  0x75   :  { %1040 = vmatprep.subr.bf16.mxu1 %v1858_v7  ;;  %v1942_v7 = vld [vmem:[#allocation5 + $0x394] ss:$8 sps:$4 sm:$0xff]  }
  0x76   :  { %944 = vmatmul.mubr.bf16.vlgmr.msra.gmra.mxu0 %v1539_v8  ;;  %v1937_v8 = vld [vmem:[#allocation5 + $0x290] ss:$8 sps:$4 sm:$0xff]  }
  0x77   :  { %987 = vmatmul.mubr.bf16.vlgmr.msra.gmra.mxu1 %v1541_v9  ;;  %998 = vmatpush1.bf16.msra.mxu0 %v1853_v10  ;;  %v1940_v9 = vld [vmem:[#allocation5 + $0x390] ss:$8 sps:$4 sm:$0xff]   ;;  %v1945_v10 = vld [vmem:[#allocation5 + $0x284] ss:$8 sps:$4 sm:$0xff]  }
  0x78   :  { %1041 = vmatpush1.bf16.msra.mxu1 %v1856_v11  ;;  %999 = vmatprep.subr.bf16.mxu0 %v1861_v12  ;;  %v1948_v11 = vld [vmem:[#allocation5 + $0x384] ss:$8 sps:$4 sm:$0xff]   ;;  %v1943_v12 = vld [vmem:[#allocation5 + $0x280] ss:$8 sps:$4 sm:$0xff]  }
  0x79   :  { %1042 = vmatprep.subr.bf16.mxu1 %v1864_v13  ;;  %1029 = vmatprep.mubr.bf16.mxu0 %v1544_v42  ;;  %v1946_v13 = vld [vmem:[#allocation5 + $0x380] ss:$8 sps:$4 sm:$0xff]   ;;  %v1990_v42 = vld [vmem:[#allocation7 + $0xa4] ss:$8 sps:$4 sm:$0xff]  }
  0x7a   :  { %1072 = vmatprep.mubr.bf16.mxu1 %v1546_v43  ;;  %v1988_v43 = vld [vmem:[#allocation7 + $0xa0] ss:$8 sps:$4 sm:$0xff]  }
  0x7b   :  { %1000 = vmatpush1.bf16.msra.mxu0 %v1859_v14  ;;  %v1543_v14 = vcombine.low %v2190_v36, %v2192_v38  ;;  %v1981_v36 = vld [vmem:[#allocation7 + $0xd4] ss:$8 sps:$4 sm:$0xff]   ;;  %v1984_v38 = vld [vmem:[#allocation7 + $0xc4] ss:$8 sps:$4 sm:$0xff]  }
  0x7c   :  { %1043 = vmatpush1.bf16.msra.mxu1 %v1862_v15  ;;  %1001 = vmatprep.subr.bf16.mxu0 %v1867_v16  ;;  %v1545_v15 = vcombine.low %v2194_v39, %v2196_v40  ;;  %v1949_v16 = vld [vmem:[#allocation7 + $0x70] ss:$8 sps:$4 sm:$0xff]   ;;  %v1982_v39 = vld [vmem:[#allocation7 + $0xc0] ss:$8 sps:$4 sm:$0xff]   ;;  %v1987_v40 = vld [vmem:[#allocation7 + $0xb4] ss:$8 sps:$4 sm:$0xff]  }
  0x7d   :  { %1044 = vmatprep.subr.bf16.mxu1 %v1870_v17  ;;  %v1951_v17 = vld [vmem:[#allocation7 + $0x74] ss:$8 sps:$4 sm:$0xff]  }
  0x7f   :  { %1002 = vmatpush1.bf16.msra.mxu0 %v1865_v18  ;;  %v1954_v18 = vld [vmem:[#allocation7 + $0x64] ss:$8 sps:$4 sm:$0xff]  }
  0x80   :  { %1045 = vmatpush1.bf16.msra.mxu1 %v1868_v19  ;;  %1003 = vmatprep.subr.bf16.mxu0 %v1873_v20  ;;  %v1952_v19 = vld [vmem:[#allocation7 + $0x60] ss:$8 sps:$4 sm:$0xff]   ;;  %v1957_v20 = vld [vmem:[#allocation7 + $0x54] ss:$8 sps:$4 sm:$0xff]  }
  0x81   :  { %1046 = vmatprep.subr.bf16.mxu1 %v1876_v21  ;;  %v1955_v21 = vld [vmem:[#allocation7 + $0x50] ss:$8 sps:$4 sm:$0xff]  }
  0x83   :  { %1004 = vmatpush1.bf16.msra.mxu0 %v1871_v22  ;;  %v1960_v22 = vld [vmem:[#allocation7 + $0x44] ss:$8 sps:$4 sm:$0xff]  }
  0x84   :  { %1047 = vmatpush1.bf16.msra.mxu1 %v1874_v23  ;;  %1005 = vmatprep.subr.bf16.mxu0 %v1879_v24  ;;  %v1958_v23 = vld [vmem:[#allocation7 + $0x40] ss:$8 sps:$4 sm:$0xff]   ;;  %v1963_v24 = vld [vmem:[#allocation7 + $0x34] ss:$8 sps:$4 sm:$0xff]  }
  0x85   :  { %1048 = vmatprep.subr.bf16.mxu1 %v1882_v25  ;;  %v1961_v25 = vld [vmem:[#allocation7 + $0x30] ss:$8 sps:$4 sm:$0xff]  }
  0x87   :  { %1006 = vmatpush1.bf16.msra.mxu0 %v1877_v26  ;;  %v1966_v26 = vld [vmem:[#allocation7 + $0x24] ss:$8 sps:$4 sm:$0xff]  }
  0x88   :  { %1049 = vmatpush1.bf16.msra.mxu1 %v1880_v27  ;;  %1007 = vmatprep.subr.bf16.mxu0 %v1885_v28  ;;  %v1964_v27 = vld [vmem:[#allocation7 + $0x20] ss:$8 sps:$4 sm:$0xff]   ;;  %v1969_v28 = vld [vmem:[#allocation7 + $0x14] ss:$8 sps:$4 sm:$0xff]  }
  0x89   :  { %1050 = vmatprep.subr.bf16.mxu1 %v1888_v29  ;;  %v1967_v29 = vld [vmem:[#allocation7 + $0x10] ss:$8 sps:$4 sm:$0xff]  }
  0x8b   :  { %1008 = vmatpush1.bf16.msra.mxu0 %v1883_v30  ;;  %v1972_v30 = vld [vmem:[#allocation7 + $0x4] ss:$8 sps:$4 sm:$0xff]  }
  0x8c   :  { %1051 = vmatpush1.bf16.msra.mxu1 %v1886_v31  ;;  %1009 = vmatprep.subr.bf16.mxu0 %v1891_v32  ;;  %v1970_v31 = vld [vmem:[#allocation7] ss:$8 sps:$4 sm:$0xff]   ;;  %v1975_v32 = vld [vmem:[#allocation7 + $0xf4] ss:$8 sps:$4 sm:$0xff]  }
  0x8d   :  { %1052 = vmatprep.subr.bf16.mxu1 %v1894_v33  ;;  %v1973_v33 = vld [vmem:[#allocation7 + $0xf0] ss:$8 sps:$4 sm:$0xff]  }
  0x8f   :  { %1010 = vmatpush1.bf16.msra.mxu0 %v1889_v34  ;;  %v1978_v34 = vld [vmem:[#allocation7 + $0xe4] ss:$8 sps:$4 sm:$0xff]  }
  0x90   :  { %1053 = vmatpush1.bf16.msra.mxu1 %v1892_v35  ;;  %1011 = vmatprep.subr.bf16.mxu0 %v1897_v37  ;;  %v1976_v35 = vld [vmem:[#allocation7 + $0xe0] ss:$8 sps:$4 sm:$0xff]   ;;  %v1979_v37 = vld [vmem:[#allocation7 + $0xd0] ss:$8 sps:$4 sm:$0xff]  }
  0x91   :  { %1054 = vmatprep.subr.bf16.mxu1 %v1900_v41  ;;  %v1985_v41 = vld [vmem:[#allocation7 + $0xb0] ss:$8 sps:$4 sm:$0xff]  }
  0x93   :  { %1012 = vmatpush1.bf16.msra.mxu0 %v1895_v44  ;;  %v1993_v44 = vld [vmem:[#allocation7 + $0x94] ss:$8 sps:$4 sm:$0xff]  }
  0x94   :  { %1055 = vmatpush1.bf16.msra.mxu1 %v1898_v45  ;;  %1013 = vmatprep.subr.bf16.mxu0 %v1903_v46  ;;  %v1991_v45 = vld [vmem:[#allocation7 + $0x90] ss:$8 sps:$4 sm:$0xff]   ;;  %v1996_v46 = vld [vmem:[#allocation7 + $0x84] ss:$8 sps:$4 sm:$0xff]  }
  0x95   :  { %1056 = vmatprep.subr.bf16.mxu1 %v1906_v47  ;;  %v1994_v47 = vld [vmem:[#allocation7 + $0x80] ss:$8 sps:$4 sm:$0xff]  }
  0x97   :  { %1014 = vmatpush2.bf16.msra.mxu0 %v1901_v48  ;;  %v1997_v48 = vld [vmem:[#allocation8 + $0x78] sm:$0xff]  }
  0x98   :  { %1057 = vmatpush2.bf16.msra.mxu1 %v1904_v49  ;;  %1015 = vmatprep.subr.bf16.mxu0 %v1909_v50  ;;  %v1998_v49 = vld [vmem:[#allocation8 + $0x38] sm:$0xff]   ;;  %v1999_v50 = vld [vmem:[#allocation8 + $0x70] sm:$0xff]  }
  0x99   :  { %1058 = vmatprep.subr.bf16.mxu1 %v1912_v51  ;;  %v2000_v51 = vld [vmem:[#allocation8 + $0x30] sm:$0xff]  }
  0x9b   :  { %1016 = vmatpush2.bf16.msra.mxu0 %v1907_v52  ;;  %v2001_v52 = vld [vmem:[#allocation8 + $0x68] sm:$0xff]  }
  0x9c   :  { %1059 = vmatpush2.bf16.msra.mxu1 %v1910_v53  ;;  %1017 = vmatprep.subr.bf16.mxu0 %v1915_v54  ;;  %v2002_v53 = vld [vmem:[#allocation8 + $0x28] sm:$0xff]   ;;  %v2003_v54 = vld [vmem:[#allocation8 + $0x60] sm:$0xff]  }
  0x9d   :  { %1060 = vmatprep.subr.bf16.mxu1 %v1918_v55  ;;  %v2004_v55 = vld [vmem:[#allocation8 + $0x20] sm:$0xff]  }
  0x9f   :  { %1018 = vmatpush2.bf16.msra.mxu0 %v1913_v56  ;;  %v2005_v56 = vld [vmem:[#allocation8 + $0x58] sm:$0xff]  }
  0xa0   :  { %1061 = vmatpush2.bf16.msra.mxu1 %v1916_v57  ;;  %1019 = vmatprep.subr.bf16.mxu0 %v1921_v58  ;;  %v2006_v57 = vld [vmem:[#allocation8 + $0x18] sm:$0xff]   ;;  %v221_v58 = vlaneseq }
  0xa1   :  { %1062 = vmatprep.subr.bf16.mxu1 %v1924_v59 }
  0xa2   :  { %v222_v59 = vshrl.u32 %v221_v58, 7 }
  0xa3   :  { %1020 = vmatpush2.bf16.msra.mxu0 %v1919_v60 }
  0xa4   :  { %1063 = vmatpush2.bf16.msra.mxu1 %v1922_v61  ;;  %1021 = vmatprep.subr.bf16.mxu0 %v1927_v62  ;;  %v227_v62 = vsub.s32 1, %v222_v59 }
  0xa5   :  { %1064 = vmatprep.subr.bf16.mxu1 %v1930_v63  ;;  %v219_v63 = vld [vmem:[%s2223_s2] sm:$0x3] }
  0xa7   :  { %1022 = vmatpush2.bf16.msra.mxu0 %v1925_v0  ;;  %v223_v0 = vsub.s32 0, %v222_v59 }
  0xa8   :  { %1065 = vmatpush2.bf16.msra.mxu1 %v1928_v1  ;;  %1023 = vmatprep.subr.bf16.mxu0 %v1933_v2 }
  0xa9   :  { %1066 = vmatprep.subr.bf16.mxu1 %v1936_v3  ;;  %v228_v3 = vrot.slane %v219_v63, %v227_v62 }
  0xab   :  { %1024 = vmatpush2.bf16.msra.mxu0 %v1931_v4  ;;  %v224_v4 = vrot.slane %v219_v63, %v223_v0 }
  0xac   :  { %1067 = vmatpush2.bf16.msra.mxu1 %v1934_v5  ;;  %1025 = vmatprep.subr.bf16.mxu0 %v1939_v6 }
  0xad   :  { %1068 = vmatprep.subr.bf16.mxu1 %v1942_v7 }
  0xaf   :  { %1026 = vmatpush2.bf16.msra.mxu0 %v1937_v8 }
  0xb0   :  { %1069 = vmatpush2.bf16.msra.mxu1 %v1940_v9  ;;  %1027 = vmatprep.subr.bf16.mxu0 %v1945_v10 }
  0xb1   :  { %1070 = vmatprep.subr.bf16.mxu1 %v1948_v11 }
  0xb3   :  { %1028 = vmatpush2.bf16.msra.mxu0 %v1943_v12 }
  0xb4   :  { %1071 = vmatpush2.bf16.msra.mxu1 %v1946_v13  ;;  %1293 = vmatprep.subr.bf16.mxu0 %v1951_v17 }
  0xb5   :  { %1724 = vmatprep.subr.bf16.mxu1 %v1997_v48 }
  0xb6   :  { %1030 = vmatmul.mubr.bf16.vlgmr.msra.gmra.mxu0 %v1543_v14 }
  0xb7   :  { %1073 = vmatmul.mubr.bf16.vlgmr.msra.gmra.mxu1 %v1545_v15  ;;  %1294 = vmatpush1.bf16.msra.mxu0 %v1949_v16 }
  0xb8   :  { %1295 = vmatprep.subr.bf16.mxu0 %v1954_v18  ;;  %1725 = vmatpush3.bf16.msra.mxu1 %v1998_v49 }
  0xb9   :  { %1726 = vmatprep.subr.bf16.mxu1 %v1999_v50 }
  0xbb   :  { %1296 = vmatpush1.bf16.msra.mxu0 %v1952_v19 }
  0xbc   :  { %1297 = vmatprep.subr.bf16.mxu0 %v1957_v20  ;;  %1727 = vmatpush3.bf16.msra.mxu1 %v2000_v51 }
  0xbd   :  { %1728 = vmatprep.subr.bf16.mxu1 %v2001_v52 }
  0xbf   :  { %1298 = vmatpush1.bf16.msra.mxu0 %v1955_v21 }
  0xc0   :  { %1299 = vmatprep.subr.bf16.mxu0 %v1960_v22  ;;  %1729 = vmatpush3.bf16.msra.mxu1 %v2002_v53 }
  0xc1   :  { %1730 = vmatprep.subr.bf16.mxu1 %v2003_v54 }
  0xc3   :  { %1300 = vmatpush1.bf16.msra.mxu0 %v1958_v23 }
  0xc4   :  { %1301 = vmatprep.subr.bf16.mxu0 %v1963_v24  ;;  %1731 = vmatpush3.bf16.msra.mxu1 %v2004_v55 }
  0xc5   :  { %1732 = vmatprep.subr.bf16.mxu1 %v2005_v56 }
  0xc7   :  { %1302 = vmatpush1.bf16.msra.mxu0 %v1961_v25 }
  0xc8   :  { %1303 = vmatprep.subr.bf16.mxu0 %v1966_v26  ;;  %1733 = vmatpush3.bf16.msra.mxu1 %v2006_v57 }
  0xcb   :  { %1304 = vmatpush1.bf16.msra.mxu0 %v1964_v27 }
  0xcc   :  { %1305 = vmatprep.subr.bf16.mxu0 %v1969_v28 }
  0xcf   :  { %1306 = vmatpush1.bf16.msra.mxu0 %v1967_v29 }
  0xd0   :  { %1307 = vmatprep.subr.bf16.mxu0 %v1972_v30 }
  0xd3   :  { %1308 = vmatpush1.bf16.msra.mxu0 %v1970_v31 }
  0xd4   :  { %1309 = vmatprep.subr.bf16.mxu0 %v1975_v32 }
  0xd7   :  { %1310 = vmatpush2.bf16.msra.mxu0 %v1973_v33 }
  0xd8   :  { %1311 = vmatprep.subr.bf16.mxu0 %v1978_v34 }
  0xdb   :  { %1312 = vmatpush2.bf16.msra.mxu0 %v1976_v35 }
  0xdc   :  { %1313 = vmatprep.subr.bf16.mxu0 %v1981_v36 }
  0xdf   :  { %1314 = vmatpush2.bf16.msra.mxu0 %v1979_v37 }
  0xe0   :  { %1315 = vmatprep.subr.bf16.mxu0 %v1984_v38 }
  0xe3   :  { %1316 = vmatpush2.bf16.msra.mxu0 %v1982_v39  ;;  %v2007_v39 = vld [vmem:[#allocation8 + $0x50] sm:$0xff]  }
  0xe4   :  { %1317 = vmatprep.subr.bf16.mxu0 %v1987_v40  ;;  %v2008_v40 = vld [vmem:[#allocation8 + $0x10] sm:$0xff]   ;;  %1734 = vmatprep.subr.bf16.mxu1 %v2007_v39 }
  0xe5   :  { %1735 = vmatpush3.bf16.msra.mxu1 %v2008_v40 }
  0xe7   :  { %1318 = vmatpush2.bf16.msra.mxu0 %v1985_v41  ;;  %v2009_v41 = vld [vmem:[#allocation8 + $0x48] sm:$0xff]  }
  0xe8   :  { %1319 = vmatprep.subr.bf16.mxu0 %v1990_v42  ;;  %v2010_v42 = vld [vmem:[#allocation8 + $0x8] sm:$0xff]   ;;  %1736 = vmatprep.subr.bf16.mxu1 %v2009_v41 }
  0xe9   :  { %1737 = vmatpush3.bf16.msra.mxu1 %v2010_v42 }
  0xeb   :  { %1320 = vmatpush2.bf16.msra.mxu0 %v1988_v43  ;;  %v2011_v43 = vld [vmem:[#allocation8 + $0x40] sm:$0xff]  }
  0xec   :  { %1321 = vmatprep.subr.bf16.mxu0 %v1993_v44  ;;  %v2012_v44 = vld [vmem:[#allocation8] sm:$0xff]   ;;  %1738 = vmatprep.subr.bf16.mxu1 %v2011_v43 }
  0xed   :  { %1739 = vmatpush3.bf16.msra.mxu1 %v2012_v44 }
  0xef   :  { %1322 = vmatpush2.bf16.msra.mxu0 %v1991_v45  ;;  %v1121_v45 = vld [vmem:[%s2225_s4] sm:$0x3] }
  0xf0   :  { %1323 = vmatprep.subr.bf16.mxu0 %v1996_v46  ;;  %v1126_v48 = vrot.slane %v1121_v45, %v223_v0 }
  0xf3   :  { %1324 = vmatpush2.bf16.msra.mxu0 %v1994_v47  ;;  %v1130_v47 = vrot.slane %v1121_v45, %v227_v62  ;;  %v1707_v62 = vld [vmem:[%s2227_s6] ss:$0 sm:$0xff] }
 0x136   :  { %v945_v60 = vpop.f32.mrf.mxu0 }
 0x137   :  { %v988_v61 = vpop.f32.mrf.mxu1  ;;  %v946_v8 = vadd.f32 %v945_v60, %v224_v4 }
 0x138   :  { %v947_v1 = vpop.f32.mrf.mxu0 }
 0x139   :  { %v990_v2 = vpop.f32.mrf.mxu1  ;;  %v948_v7 = vadd.f32 %v947_v1, %v228_v3  ;;  %v989_v16 = vadd.f32 %v988_v61, %v946_v8 }
 0x13a   :  { %v949_v5 = vpop.f32.mrf.mxu0 }
 0x13b   :  { %v992_v6 = vpop.f32.mrf.mxu1  ;;  %v950_v11 = vadd.f32 %v949_v5, %v224_v4  ;;  %v991_v14 = vadd.f32 %v990_v2, %v948_v7 }
 0x13c   :  { %v951_v9 = vpop.f32.mrf.mxu0 }
 0x13d   :  { %v994_v10 = vpop.f32.mrf.mxu1  ;;  %v952_v15 = vadd.f32 %v951_v9, %v228_v3  ;;  %v993_v19 = vadd.f32 %v992_v6, %v950_v11 }
 0x13f   :  { %v995_v24 = vadd.f32 %v994_v10, %v952_v15 }
 0x176   :  { %v1031_v12 = vpop.f32.mrf.mxu0 }
 0x177   :  { %v1074_v13 = vpop.f32.mrf.mxu1  ;;  %v1032_v21 = vadd.f32 %v1031_v12, %v989_v16 }
 0x178   :  { %v1033_v17 = vpop.f32.mrf.mxu0 }
 0x179   :  { %v1076_v18 = vpop.f32.mrf.mxu1  ;;  %v1034_v20 = vadd.f32 %v1033_v17, %v991_v14  ;;  %v1075_v30 = vadd.f32 %v1074_v13, %v1032_v21 }
 0x17a   :  { %v1035_v22 = vpop.f32.mrf.mxu0 }
 0x17b   :  { %v1078_v23 = vpop.f32.mrf.mxu1  ;;  %v1036_v25 = vadd.f32 %v1035_v22, %v993_v19  ;;  %v1077_v27 = vadd.f32 %v1076_v18, %v1034_v20  ;;  %v1083_v36 = vmax.f32 %v1075_v30, 0.0 }
 0x17c   :  { %v1037_v26 = vpop.f32.mrf.mxu0 }
 0x17d   :  { %v1079_v28 = vadd.f32 %v1078_v23, %v1036_v25  ;;  %v1038_v29 = vadd.f32 %v1037_v26, %v995_v24  ;;  %v1080_v31 = vpop.f32.mrf.mxu1  ;;  %v1084_v34 = vmax.f32 %v1077_v27, 0.0 }
 0x17f   :  { %v1081_v32 = vadd.f32 %v1080_v31, %v1038_v29  ;;  %v1085_v33 = vmax.f32 %v1079_v28, 0.0 }
 0x181   :  { %v1086_v35 = vmax.f32 %v1081_v32, 0.0  ;;  %v1087_v38 = vpack.c.bf16 %v1085_v33, %v1083_v36 }
 0x183   :  { %v1088_v37 = vpack.c.bf16 %v1086_v35, %v1084_v34 }
 0x185   :  { %1325 = vmatprep.mubr.bf16.mxu0 %v1088_v37 }
 0x186   :  { %1326 = vmatmul.mubr.bf16.vlgmr.msra.gmra.mxu0 %v1087_v38 }
 0x246   :  { %v1327_v46 = vpop.f32.mrf.mxu0 }
 0x247   :  { %v1328_v53 = vadd.f32 %v1327_v46, %v1126_v48 }
 0x248   :  { %v1329_v49 = vpop.f32.mrf.mxu0 }
 0x249   :  { %v1330_v51 = vadd.f32 %v1329_v49, %v1130_v47  ;;  %v1336_v59 = vmax.f32 %v1328_v53, 0.0 }
 0x24a   :  { %v1331_v50 = vpop.f32.mrf.mxu0 }
 0x24b   :  { %v1332_v52 = vadd.f32 %v1331_v50, %v1126_v48  ;;  %v1337_v57 = vmax.f32 %v1330_v51, 0.0 }
 0x24c   :  { %v1333_v54 = vpop.f32.mrf.mxu0 }
 0x24d   :  { %v1334_v55 = vadd.f32 %v1333_v54, %v1130_v47  ;;  %v1338_v56 = vmax.f32 %v1332_v52, 0.0 }
 0x24f   :  { %v1339_v58 = vmax.f32 %v1334_v55, 0.0  ;;  %v1340_v61 = vpack.c.bf16 %v1338_v56, %v1336_v59 }
 0x251   :  { %v1341_v60 = vpack.c.bf16 %v1339_v58, %v1337_v57 }
 0x253   :  { %1509 = vmatprep.mubr.bf16.mxu1 %v1341_v60 }
 0x254   :  { %1510 = vmatmul.mubr.bf16.vlgmr.msra.gmra.mxu1 %v1340_v61 }
 0x314   :  { %v1740_v63 = vpop.f32.mrf.mxu1 }
 0x316   :  { %v1741_v0 = vpop.f32.mrf.mxu1 }
 0x317   :  { %v1742_v1 = vadd.f32 %v1741_v0, %v1740_v63 }
 0x318   :  { %v1743_v2 = vpop.f32.mrf.mxu1 }
 0x319   :  { %v1512_v3 = vadd.f32 %v1742_v1, %v1707_v62 }
 0x31a   :  { %v1744_v4 = vpop.f32.mrf.mxu1 }
 0x31b   :  { %1518 = vst [vmem:[#allocation10] sm:$0xff] %v1512_v3  ;;  %v1745_v5 = vadd.f32 %v1744_v4, %v1743_v2 }
 0x31d   :  { %v1515_v6 = vadd.f32 %v1745_v5, %v1707_v62 }
 0x31f   :  { %1519 = vst [vmem:[#allocation10 + $0x8] sm:$0xff] %v1515_v6 }
 0x320   :  { %2104 = shalt.err (!%p2101_p10)
}
 0x321   :  { %1531 = dma.vmem_to_hbm [thread:$0]  %s1526_s30, 256, %s2228_s7, [#allocation4], %s2122_s27, %s2122_s27, %s2123_s28  }
 0x322   :  { %2119 = dma.done.wait [#allocation4], 256  }
 0x323   :  { %2120 = vsyncadd [#allocation4], 4294967040 }
 0x324   :  { %1535 = vsyncpa [#allocation3], 1 }
 0x325   :  { %1536 = vsyncpa [#allocation6], 1 }
 0x326   :  { %1537 = vsyncpa [#allocation9], 1 }
 0x327   :  { %1538 = vsyncpa [#allocation4], 1 }

</bundles_post_ra>
